<compile_context>
chip_gen: v5e
topology: v5e:2x2
jax: 0.10.0
libtpu: 0.0.40
codegen_flags: <defaults>
</compile_context>

<pallas_src>
import jax
import jax.numpy as jnp
from jax.experimental import pallas as pl
from jax.experimental.pallas import tpu as pltpu

_MiB = 1024 * 1024


def _make_hbm_copy_kernel(chunks):
    """Build a kernel that copies `chunks` (static (start, size) row ranges)
    of the input HBM ref to the output HBM ref via async DMA."""

    def kernel(x_hbm, o_hbm, sem):
        copies = []
        for i, (start, size) in enumerate(chunks):
            cp = pltpu.make_async_copy(
                x_hbm.at[pl.ds(start, size)],
                o_hbm.at[pl.ds(start, size)],
                sem.at[i],
            )
            cp.start()
            copies.append(cp)
        # Wait for all outstanding chunk DMAs.
        for cp in copies:
            cp.wait()

    return kernel


def _chunk_ranges(rows, total_bytes):
    """Static even split of `rows` into a few DMA chunks (more chunks only for
    big tensors so several DMA engines can run concurrently)."""
    if total_bytes >= 8 * _MiB and rows >= 8:
        n_chunks = 8
    elif total_bytes >= 1 * _MiB and rows >= 2:
        n_chunks = 2
    else:
        n_chunks = 1
    n_chunks = max(1, min(n_chunks, rows))

    base = rows // n_chunks
    rem = rows % n_chunks
    chunks = []
    start = 0
    for i in range(n_chunks):
        size = base + (1 if i < rem else 0)
        if size == 0:
            continue
        chunks.append((start, size))
        start += size
    return chunks


def _forced_copy(x):
    """Materialize a copy of x via chunked HBM->HBM DMA (no VMEM staging)."""
    total = x.size
    itemsize = jnp.dtype(x.dtype).itemsize
    total_bytes = total * itemsize

    # Flatten.  A lane-dense 2D view is used when it exists (cheap reshape),
    # otherwise a 1D view — for a pure DMA copy the layout barely matters.
    lane = 0
    for cand in (8192, 4096, 2048, 1024, 512, 256, 128):
        if total % cand == 0:
            lane = cand
            break
    if lane:
        flat = x.reshape(total // lane, lane)
    else:
        flat = x.reshape(total)

    rows = flat.shape[0]
    chunks = _chunk_ranges(rows, total_bytes)

    out = pl.pallas_call(
        _make_hbm_copy_kernel(chunks),
        out_shape=jax.ShapeDtypeStruct(flat.shape, flat.dtype),
        in_specs=[pl.BlockSpec(memory_space=pl.ANY)],
        out_specs=pl.BlockSpec(memory_space=pl.ANY),
        scratch_shapes=[pltpu.SemaphoreType.DMA((len(chunks),))],
    )(flat)

    return out.reshape(x.shape)


def identity(x, *, force_copy=False):
    """Identity forward pass (matches PyTorch `Identity.forward`).

    Default path: return x directly — strictly cheaper than any kernel on
    every TPU generation.  `force_copy=True` returns a freshly materialized
    buffer via the chunked HBM->HBM DMA kernel above.
    """
    if not force_copy or x.size == 0:
        return x
    return _forced_copy(x)


if __name__ == "__main__":
    key = jax.random.PRNGKey(0)
    # Small NCHW input consistent with typical module usage.
    x = jax.random.normal(key, (2, 4, 16, 16), dtype=jnp.float32)

    # Default path: pure pass-through (no kernel launch) — the optimal Identity.
    y_fast = identity(x)
    jax.block_until_ready(y_fast)
    assert y_fast.shape == x.shape and y_fast.dtype == x.dtype
    assert bool(jnp.all(y_fast == x))

    # Escape hatch: exercise the Pallas HBM->HBM DMA copy kernel on TPU.
    y = identity(x, force_copy=True)
    jax.block_until_ready(y)
    assert y.shape == x.shape and y.dtype == x.dtype
    assert bool(jnp.all(y == x))

    print("KERNEL_OK")
</pallas_src>

<mosaic_0001>
module attributes {stable_mosaic.version = 11 : i64} {
  func.func @kernel(%arg0: memref<1x2048xf32, #tpu.memory_space<any>>, %arg1: memref<1x2048xf32, #tpu.memory_space<any>>, %arg2: memref<1x!tpu.dma_semaphore, #tpu.memory_space<semaphore_mem>>) attributes {dimension_semantics = [], scalar_prefetch = 0 : i64, scratch_operands = 1 : i64, tpu.core_type = #tpu.core_type<tc>} {
    %c0_i32 = arith.constant 0 : i32
    %c0_i32_0 = arith.constant 0 : i32
    %c0_i32_1 = arith.constant 0 : i32
    %0 = tpu.memref_slice %arg0[%c0_i32_0, %c0_i32_1] : memref<1x2048xf32, #tpu.memory_space<any>> -> memref<1x2048xf32, #tpu.memory_space<any>>
    %c0_i32_2 = arith.constant 0 : i32
    %c0_i32_3 = arith.constant 0 : i32
    %1 = tpu.memref_slice %arg1[%c0_i32_2, %c0_i32_3] : memref<1x2048xf32, #tpu.memory_space<any>> -> memref<1x2048xf32, #tpu.memory_space<any>>
    %2 = tpu.memref_slice %arg2[%c0_i32] : memref<1x!tpu.dma_semaphore, #tpu.memory_space<semaphore_mem>> -> memref<1x!tpu.dma_semaphore, #tpu.memory_space<semaphore_mem>>
    %3 = tpu.memref_squeeze %2 : memref<1x!tpu.dma_semaphore, #tpu.memory_space<semaphore_mem>> -> memref<!tpu.dma_semaphore, #tpu.memory_space<semaphore_mem>>
    tpu.enqueue_dma source(%0 : memref<1x2048xf32, #tpu.memory_space<any>>) target(%1 : memref<1x2048xf32, #tpu.memory_space<any>>) target_semaphore(%3 : memref<!tpu.dma_semaphore, #tpu.memory_space<semaphore_mem>>)
    %c0_i32_4 = arith.constant 0 : i32
    %c0_i32_5 = arith.constant 0 : i32
    %c0_i32_6 = arith.constant 0 : i32
    %4 = tpu.memref_slice %arg0[%c0_i32_5, %c0_i32_6] : memref<1x2048xf32, #tpu.memory_space<any>> -> memref<1x2048xf32, #tpu.memory_space<any>>
    %c0_i32_7 = arith.constant 0 : i32
    %c0_i32_8 = arith.constant 0 : i32
    %5 = tpu.memref_slice %arg1[%c0_i32_7, %c0_i32_8] : memref<1x2048xf32, #tpu.memory_space<any>> -> memref<1x2048xf32, #tpu.memory_space<any>>
    %6 = tpu.memref_slice %arg2[%c0_i32_4] : memref<1x!tpu.dma_semaphore, #tpu.memory_space<semaphore_mem>> -> memref<1x!tpu.dma_semaphore, #tpu.memory_space<semaphore_mem>>
    %7 = tpu.memref_squeeze %6 : memref<1x!tpu.dma_semaphore, #tpu.memory_space<semaphore_mem>> -> memref<!tpu.dma_semaphore, #tpu.memory_space<semaphore_mem>>
    tpu.wait_dma2 semaphore(%7 : memref<!tpu.dma_semaphore, #tpu.memory_space<semaphore_mem>>) src(%4 : memref<1x2048xf32, #tpu.memory_space<any>>) dst(%5 : memref<1x2048xf32, #tpu.memory_space<any>>)
    return
  }
}

</mosaic_0001>

<bundles_post_ra>
// kernel: tpu_custom_call.1
= control target key start
LH: loop header
LB: loop body
LE: loop exit
PB: predicated region body
PF: predicated region fallthrough
CT: control target
= control target key end

     0   :  { %s32_s12 = smov [#allocation2]   ;;  %s33_s13 = smov [#allocation3]   ;;  %s51_s0 = inlined_call_operand.hbm [shape: f32[1,2048], index: 0, kind: input, shape index: {}]   ;;  %s52_s1 = inlined_call_operand.hbm [shape: f32[1,2048], index: 1, kind: output, shape index: {}]  }
   0x1   :  { %s10_s8 = sshll.u32 %s51_s0, 4  ;;  %s12_s11 = sshll.u32 %s52_s1, 4  ;;  %s11_s8 = int_to_ptr.hbm [resolvable:$true] %s10_s8  ;;  %s13_s11 = int_to_ptr.hbm [resolvable:$true] %s12_s11 }
   0x2   :  { %s34_s14 = smov 0  }
   0x3   :  { %16 = dma.general %s11_s8, 256, %s13_s11, %s32_s12, %s33_s13, [#allocation4], %s34_s14, 0  }
   0x4   :  { %30 = dma.done.wait [#allocation2], 256 }
   0x5   :  { %31 = vsyncadd [#allocation2], 4294967040 }
   0x6   :  { %20 = vsyncmov [#allocation2] }
   0x9   :  { %s21_s15 = vpop.sfrf %20 }
   0xa   :  { %p26_p0 = scmp.ne.s32.totalorder %s21_s15, 0 }
   0xc   :  { %25 = shalt.err (%p26_p0)  }

</bundles_post_ra>
